<compile_context>
chip_gen: v7x
topology: tpu7x:2x2x1
jax: 0.10.0
libtpu: 0.0.40
codegen_flags: <defaults>
</compile_context>

<pallas_src>
import jax
import jax.numpy as jnp
from jax.experimental import pallas as pl
from jax.experimental.pallas import tpu as pltpu


# --------------------------- pe buffer (matches torch __init__) ---------------------------

def make_positional_encoding(d_model, max_len=600, dtype=jnp.float32):
    """Exactly the buffer built in PositionalEncoding.__init__ (d_model assumed even)."""
    pos = jnp.arange(max_len, dtype=jnp.float32)[:, None]                      # (max_len, 1)
    div = jnp.exp(jnp.arange(0, d_model, 2, dtype=jnp.float32)
                  * (-jnp.log(jnp.float32(10000.0)) / d_model))                # (d_model/2,)
    pe = jnp.zeros((max_len, d_model), jnp.float32)
    pe = pe.at[:, 0::2].set(jnp.sin(pos * div))
    pe = pe.at[:, 1::2].set(jnp.cos(pos * div))
    return pe.astype(dtype)                                                    # (max_len, d_model)


# --------------------------------------- kernel -------------------------------------------

def _pe_add_kernel(x_ref, pe_ref, o_ref):
    # x_ref: (block_b, block_n), pe_ref: (1, block_n) -> broadcast add over batch rows.
    o_ref[...] = x_ref[...] + pe_ref[...]


def _largest_divisor(n, unit, cap):
    """Largest divisor of n that is a multiple of `unit` and <= cap (None if none)."""
    best = None
    hi = min(n, max(cap, unit))
    for d in range(unit, hi + 1, unit):
        if n % d == 0:
            best = d
    return best


def _pick_tiles(B, SD, itemsize, vmem_budget_bytes):
    """Pick (block_b, block_n): lane-dense column tile and the largest batch tile that fits."""
    # Column tile: keep the full flattened row if it fits; otherwise split it into
    # lane-dense (multiple-of-128) chunks so stores stay unmasked full-width `vst`.
    # Budget per grid step ~ (x block + out block) double-buffered + pe slab.
    row_bytes = SD * itemsize
    if 5 * row_bytes <= vmem_budget_bytes or SD < 128 or SD % 128 != 0:
        block_n = SD
    else:
        cap = max(128, vmem_budget_bytes // (5 * itemsize))
        block_n = _largest_divisor(SD, 128, cap) or SD

    # Batch tile: largest multiple of 8 dividing B within budget, keeping >=2 grid
    # steps when possible (megacore); otherwise a single full-extent block.
    blk_bytes = block_n * itemsize
    max_rows = max(1, vmem_budget_bytes // (5 * max(blk_bytes, 1)))
    if B <= 8 or B % 8 != 0:
        block_b = B
    else:
        cand = [b for b in range(8, B, 8) if B % b == 0 and b <= max_rows]
        block_b = max(cand) if cand else B
    return block_b, block_n


def positional_encoding_forward(x, pe, *, vmem_budget_bytes=8 << 20):
    """x: (B, S, D) float; pe: (max_len, D). Returns x + pe[None, :S, :]."""
    B, S, D = x.shape
    max_len, d_model = pe.shape
    assert S <= max_len and D == d_model
    SD = S * D

    x2 = x.reshape(B, SD)                               # lane-dense rows (last dim = S*D)
    pe_row = pe[:S, :].astype(x.dtype).reshape(1, SD)   # == pe[:, :S, :], flattened

    block_b, block_n = _pick_tiles(B, SD, x.dtype.itemsize, vmem_budget_bytes)
    grid = (B // block_b, SD // block_n)

    out = pl.pallas_call(
        _pe_add_kernel,
        out_shape=jax.ShapeDtypeStruct((B, SD), x.dtype),
        grid=grid,
        in_specs=[
            pl.BlockSpec((block_b, block_n), lambda i, j: (i, j)),  # x tile
            pl.BlockSpec((1, block_n), lambda i, j: (0, j)),        # pe slab (const over batch)
        ],
        out_specs=pl.BlockSpec((block_b, block_n), lambda i, j: (i, j)),
        compiler_params=pltpu.CompilerParams(
            dimension_semantics=("parallel", "parallel")),
    )(x2, pe_row)

    return out.reshape(B, S, D)


# ----------------------------------- pure-JAX reference -----------------------------------

def reference_forward(x, pe):
    S = x.shape[1]
    return x + pe[None, :S, :].astype(x.dtype)


if __name__ == "__main__":
    key = jax.random.PRNGKey(0)

    B, S, D = 16, 8, 32          # batch, seq_len, d_model  (S*D = 256 -> lane-dense rows)
    MAX_LEN = 600

    x = jax.random.normal(key, (B, S, D), jnp.float32)
    pe = make_positional_encoding(D, max_len=MAX_LEN, dtype=jnp.float32)

    out = positional_encoding_forward(x, pe)
    out = jax.block_until_ready(out)

    ref = reference_forward(x, pe)
    assert out.shape == (B, S, D), out.shape
    assert jnp.allclose(out, ref, atol=1e-6, rtol=1e-6)

    print("KERNEL_OK")
</pallas_src>

<mosaic_0001>
module attributes {stable_mosaic.version = 11 : i64} {
  func.func @_pe_add_kernel(%arg0: i32, %arg1: i32, %arg2: memref<8x256xf32, #tpu.memory_space<vmem>>, %arg3: memref<1x256xf32, #tpu.memory_space<vmem>>, %arg4: memref<8x256xf32, #tpu.memory_space<vmem>>) attributes {dimension_semantics = [#tpu.dimension_semantics<parallel>, #tpu.dimension_semantics<parallel>], iteration_bounds = array<i64: 2, 1>, scalar_prefetch = 0 : i64, scratch_operands = 0 : i64, tpu.core_type = #tpu.core_type<tc>, window_params = [{transform_indices = @transform_0, window_bounds = array<i64: 8, 256>}, {transform_indices = @transform_1, window_bounds = array<i64: 1, 256>}, {transform_indices = @transform_2, window_bounds = array<i64: 8, 256>}]} {
    %c0 = arith.constant 0 : index
    %c0_0 = arith.constant 0 : index
    %0 = vector.load %arg2[%c0, %c0_0] : memref<8x256xf32, #tpu.memory_space<vmem>>, vector<8x256xf32>
    %c0_1 = arith.constant 0 : index
    %c0_2 = arith.constant 0 : index
    %1 = vector.load %arg3[%c0_1, %c0_2] : memref<1x256xf32, #tpu.memory_space<vmem>>, vector<1x256xf32>
    %2 = vector.broadcast %1 : vector<1x256xf32> to vector<8x256xf32>
    %3 = arith.addf %0, %2 : vector<8x256xf32>
    %c0_3 = arith.constant 0 : index
    %c0_4 = arith.constant 0 : index
    %4 = vector.load %arg4[%c0_3, %c0_4] : memref<8x256xf32, #tpu.memory_space<vmem>>, vector<8x256xf32>
    tpu.vector_store %arg4[%c0_3, %c0_4], %3 {strides = array<i32>} : memref<8x256xf32, #tpu.memory_space<vmem>>, vector<8x256xf32>,
    return
  }
  func.func @transform_0(%arg0: i32, %arg1: i32) -> (i32, i32) {
    %c0_i32 = arith.constant 0 : i32
    return %arg0, %arg1 : i32, i32
  }
  func.func @transform_1(%arg0: i32, %arg1: i32) -> (i32, i32) {
    %c0_i32 = arith.constant 0 : i32
    %c0_i32_0 = arith.constant 0 : i32
    return %c0_i32, %arg1 : i32, i32
  }
  func.func @transform_2(%arg0: i32, %arg1: i32) -> (i32, i32) {
    %c0_i32 = arith.constant 0 : i32
    return %arg0, %arg1 : i32, i32
  }
}

</mosaic_0001>

<bundles_post_ra>
// kernel: tpu_custom_call.1
= control target key start
LH: loop header
LB: loop body
LE: loop exit
PB: predicated region body
PF: predicated region fallthrough
CT: control target
= control target key end

     0   :  { %7 = vsyncpa [#allocation3], 0  ;;  %s716_s0 = inlined_call_operand.hbm [shape: f32[16,256], index: 0, kind: input, shape index: {}]   ;;  %s717_s1 = inlined_call_operand.vmem [shape: f32[1,256], index: 1, kind: input, shape index: {}]   ;;  %s718_s2 = inlined_call_operand.hbm [shape: f32[16,256], index: 2, kind: output, shape index: {}]  }
   0x1   :  { %9 = vsyncpa [#allocation3 + $0x1], 0 }
   0x2   :  { %10 = vsyncpa [#allocation4], 0 }
   0x3   :  { %12 = vsyncpa [#allocation4 + $0x1], 0  ;;  %s541_s9 = smov 0   ;;  %s543_s10 = smov 0  }
   0x4   :  { %s545_s11 = smov 0   ;;  %s547_s12 = smov 0  }
   0x5   :  { %s549_s13 = smov 0   ;;  %s551_s14 = smov 0  }
   0x6 LB: > { %s330_s15 = sadd.s32 4294967295, %s522_s14   ;;  %s331_s16 = sadd.s32 4294967294, %s522_s14   ;;  %s522_s14 = sphi %s551_s14, %s18_s14   ;;  %s518_s13 = sphi %s549_s13, %s734_s13   ;;  %s514_s12 = sphi %s547_s12, %s733_s12   ;;  %s510_s11 = sphi %s545_s11, %s732_s11   ;;  %s506_s10 = sphi %s543_s10, %s731_s10   ;;  %s502_s9 = sphi %s541_s9, %s730_s9  }
   0x7   : > { %s30_s17 = sadd.s32 1, %s518_s13  ;;  %s39_s18 = sadd.s32 1, %s510_s11 }
   0x8   : > { %p32_p0 = scmp.ge.s32.totalorder %s30_s17, 2  ;;  %p46_p1 = scmp.ne.s32.totalorder %s510_s11, %s506_s10 }
   0x9   : > { %p47_p2 = scmp.eq.s32.totalorder %s522_s14, 0  ;;  %p52_p3 = scmp.ne.s32.totalorder %s506_s10, %s502_s9 }
   0xa   : > { %s736_s17 = smov (%p32_p0, %s30_s17), 0  ;;  %p53_p5 = scmp.eq.s32.totalorder %s330_s15, 0 }
   0xb   : > { %p582_p4 = por %p47_p2, %p46_p1  ;;  %s34_s20 = ssub.s32 %s518_s13, %s736_s17 }
   0xc   : > { %p104_p6 = scmp.eq.s32.totalorder %s330_s15, 1  ;;  %p37_p7 = scmp.eq.s32.totalorder %s34_s20, 0 }
   0xd   : > { %p588_p8 = por %p53_p5, %p52_p3  ;;  %p110_p10 = scmp.eq.s32.totalorder %s331_s16, 1 }
   0xe   : > { %p592_p9 = por %p104_p6, %p46_p1  ;;  %p360_p13 = scmp.lt.s32.totalorder %s522_s14, 2 }
   0xf   : > { %s597_s23 = scalar_select %p37_p7, %s510_s11, %s39_s18  }
  0x10   : > { %s722_s22 = scalar_select %p592_p9, 1, 0 }
  0x11   : > { %p599_p11 = por %p110_p10, %p52_p3  ;;  %s138_s25 = sand.u32 1, %s510_s11  }
  0x12   : > { %s335_s26 = sshll.u32 %s138_s25, 4  ;;  %s346_s27 = sshll.u32 %s518_s13, 8 }
  0x13   : > { %s723_s24 = scalar_select %p599_p11, 1, 0 }
  0x14   : > { %s610_s30 = scalar_lea.hbm %s716_s0, %s346_s27  ;;  %s142_s3 = scalar_lea.vmem [#allocation2], %s335_s26 }
  0x15   : > { %s152_s4 = sshll.u32 %s142_s3, 4  ;;  %p616_p0 = pnand %p360_p13, %p582_p4  ;;  %s612_s4 = int_to_ptr.vmem [resolvable:$true] %s152_s4 }
  0x16   : > { %s139_s6 = scalar_lea.sflag [#allocation3], %s138_s25  ;;  %s410_s7 = scalar_lea.hbm %s610_s30, 256 }
  0x17   : > { %p411_p3 = scmp.ne.s32.totalorder %s610_s30, %s410_s7  ;;  %p412_p5 = pneg %p616_p0 }
  0x18   : > { %s415_s16 = scalar_lea.hbm %s716_s0, 512  ;;  %p416_p4 = scmp.lt.u32.totalorder %s610_s30, %s716_s0 }
  0x19   : > { %p413_p6 = pnand %p412_p5, %p411_p3  ;;  %p417_p10 = scmp.lt.u32.totalorder %s415_s16, %s410_s7 }
  0x1a   : > { %p419_p12 = scmp.lt.u32.totalorder %s410_s7, %s610_s30 }
  0x1b   : > { %p414_p7 = pneg %p413_p6  ;;  %p418_p13 = por %p417_p10, %p416_p4 }
  0x1d   : > { %p420_p1 = por %p419_p12, %p418_p13 }
  0x1f   : > { %p421_p2 = pnand %p420_p1, %p414_p7 }
  0x21   : > { %424 = shalt.err (!%p421_p2)
}
  0x22   : > { %s425_s20 = scalar_lea.vmem %s612_s4, 256  ;;  %s524_s25 = smov [#allocation2]  }
  0x23   : > { %p426_p3 = scmp.ne.s32.totalorder %s612_s4, %s425_s20  ;;  %s430_s26 = sshll.u32 %s524_s25, 4  ;;  %s431_s26 = int_to_ptr.vmem [resolvable:$false] %s430_s26 }
  0x24   : > { %s432_s27 = scalar_lea.vmem %s431_s26, 512  ;;  %p433_p9 = scmp.lt.s32.totalorder %s612_s4, %s431_s26 }
  0x25   : > { %p428_p6 = pnand %p426_p3, %p412_p5  ;;  %p434_p4 = scmp.lt.s32.totalorder %s432_s27, %s425_s20 }
  0x27   : > { %p429_p11 = pneg %p428_p6  ;;  %p435_p10 = por %p434_p4, %p433_p9 }
  0x29   : > { %p436_p12 = pnand %p435_p10, %p429_p11 }
  0x2b   : > { %439 = shalt.err (!%p436_p12)
}
  0x2c   : > { %355 = dma.hbm_to_vmem [thread:$0]  (!%p616_p0), %s610_s30, 256, %s612_s4, %s139_s6  }
  0x2d   : > { %p725_p1 = scmp.lt.s32.totalorder %s522_s14, 3  ;;  %p726_p2 = scmp.ge.s32.totalorder %s522_s14, 1 }
  0x2f   : > { %p158_p5 = pnand %p726_p2, %p725_p1 }
  0x30   : > { %s652_s28 = sand.u32 (!%p158_p5), 1, %s506_s10  }
  0x31   : > { %161 = sbr.rel (%p158_p5) target bundleno = 83 (0x53), region = 28  ;;  %s339_s29 = sshll.u32 (!%p158_p5), %s652_s28, 4 }
  0x32   : > { %s164_s3 = scalar_lea.sflag (!%p158_p5), [#allocation3], %s652_s28  ;;  %s167_s7 = scalar_lea.vmem (!%p158_p5), [#allocation2], %s339_s29 }
  0x38   : > { %493 = dma.done.wait (%p588_p8), %s164_s3, 256  }
  0x39   : > { %495 = vsyncadd (%p588_p8), %s164_s3, 4294967040  ;;  %v203_v0 = vlaneseq  ;;  %v199_v4 = vld [vmem:[%s167_s7] sm:$0xff]  ;;  %s191_s5 = scalar_lea.vmem [#allocation5], %s339_s29  ;;  %v200_v6 = vld [vmem:[%s167_s7 + $0x8] sm:$0xff]  ;;  %s347_s8 = sshll.u32 %s514_s12, 8 }
  0x3a   : > { %v201_v5 = vld [vmem:[%s717_s1] sm:$0x3]  ;;  %s234_s6 = sshll.u32 %s191_s5, 4  ;;  %s669_s16 = scalar_lea.hbm %s718_s2, %s347_s8  ;;  %s664_s6 = int_to_ptr.vmem [resolvable:$true] %s234_s6 }
  0x3b   : > { %v204_v1 = vshrl.u32 %v203_v0, 7  ;;  %s218_s18 = scalar_lea.sflag [#allocation4], %s652_s28  ;;  %s440_s19 = scalar_lea.vmem %s664_s6, 256 }
  0x3c   : > { %p441_p8 = scmp.ne.s32.totalorder %s664_s6, %s440_s19  ;;  %p727_p9 = scmp.ne.s32.totalorder %s722_s22, 0 }
  0x3d   : > { %v205_v2 = vsub.s32 0, %v204_v1  ;;  %v209_v3 = vsub.s32 1, %v204_v1  ;;  %s525_s12 = smov [#allocation5]  }
  0x3e   : > { %p442_p11 = pnand %p441_p8, %p727_p9  ;;  %s444_s20 = sshll.u32 %s525_s12, 4  ;;  %s445_s20 = int_to_ptr.vmem [resolvable:$false] %s444_s20 }
  0x3f   : > { %v206_v7 = vrot.slane %v201_v5, %v205_v2  ;;  %v210_v8 = vrot.slane %v201_v5, %v209_v3  ;;  %s446_s25 = scalar_lea.vmem %s445_s20, 512  ;;  %p447_p7 = scmp.lt.s32.totalorder %s664_s6, %s445_s20 }
  0x40   : > { %p443_p0 = pneg %p442_p11  ;;  %p448_p13 = scmp.lt.s32.totalorder %s446_s25, %s440_s19 }
  0x41   : > { %v213_v9 = vadd.f32 %v206_v7, %v199_v4  ;;  %v214_v10 = vadd.f32 %v210_v8, %v200_v6 }
  0x42   : > { %p449_p3 = por %p448_p13, %p447_p7 }
  0x43   : > { %215 = vst [vmem:[%s191_s5] sm:$0xff] %v213_v9  ;;  %216 = vst [vmem:[%s191_s5 + $0x8] sm:$0xff] %v214_v10 }
  0x44   : > { %p450_p6 = pnand %p449_p3, %p443_p0 }
  0x46   : > { %453 = shalt.err (!%p450_p6)
}
  0x47   : > { %s454_s26 = scalar_lea.hbm %s669_s16, 256  ;;  %s458_s29 = scalar_lea.hbm %s718_s2, 512 }
  0x48   : > { %p455_p4 = scmp.ne.s32.totalorder %s669_s16, %s454_s26  ;;  %p459_p1 = scmp.lt.u32.totalorder %s669_s16, %s718_s2 }
  0x49   : > { %p460_p2 = scmp.lt.u32.totalorder %s458_s29, %s454_s26  ;;  %p462_p8 = scmp.lt.u32.totalorder %s454_s26, %s669_s16 }
  0x4a   : > { %p456_p10 = pnand %p455_p4, %p727_p9 }
  0x4b   : > { %p461_p5 = por %p460_p2, %p459_p1 }
  0x4c   : > { %p457_p12 = pneg %p456_p10 }
  0x4d   : > { %p463_p11 = por %p462_p8, %p461_p5 }
  0x4f   : > { %p464_p0 = pnand %p463_p11, %p457_p12 }
  0x51   : > { %467 = shalt.err (!%p464_p0)
}
  0x52   : > { %350 = dma.vmem_to_hbm [thread:$0]  (%p727_p9), %s664_s6, 256, %s669_s16, %s218_s18  }
  0x53 PF: > { %s246_s30 = sand.u32 1, %s502_s9   ;;  %p728_p7 = scmp.ne.s32.totalorder %s723_s24, 0 }
  0x54   : > { %p729_p13 = scmp.ge.s32.totalorder %s522_s14, 2  ;;  %s247_s4 = scalar_lea.sflag [#allocation4], %s246_s30 }
  0x56   : > { %p357_p3 = pnand %p729_p13, %p728_p7 }
  0x58   : > { %497 = dma.done.wait (!%p357_p3), %s247_s4, 256  }
  0x59   : > { %499 = vsyncadd (!%p357_p3), %s247_s4, 4294967040  ;;  %s18_s14 = sadd.s32 1, %s522_s14   ;;  %s730_s9 = smov %s506_s10 }
  0x5a   : > { %p15_p6 = scmp.ge.s32.totalorder %s18_s14, 4   ;;  %s731_s10 = smov %s510_s11 }
  0x5b   : > { %s732_s11 = smov %s597_s23  ;;  %s733_s12 = smov %s518_s13 }
  0x5c   : > { %s734_s13 = smov %s736_s17  ;;  %17 = sbr.rel (!%p15_p6) target bundleno = 6 (0x6), region = 76 }
  0x63   :  { %252 = vsyncpa [#allocation3], 1 }
  0x64   :  { %254 = vsyncpa [#allocation3 + $0x1], 1 }
  0x65   :  { %255 = vsyncpa [#allocation4], 1 }
  0x66   :  { %257 = vsyncpa [#allocation4 + $0x1], 1 }

</bundles_post_ra>
